<compile_context>
chip_gen: v7x
topology: tpu7x:2x2x1
jax: 0.10.0
libtpu: 0.0.40
codegen_flags: <defaults>
</compile_context>

<pallas_src>
import functools

import jax
import jax.numpy as jnp
from jax.experimental import pallas as pl
from jax.experimental.pallas import tpu as pltpu

MARGIN = 0.99            # module default
PD_EPS = 1e-6            # F.pairwise_distance default eps

_VMEM_BUDGET_BYTES = 16 * 1024 * 1024   # target for total in-flight (double-buffered) tile bytes
_VMEM_LIMIT_BYTES = 40 * 1024 * 1024    # scoped VMEM limit (safe on v5e/v6e/v7x)
_MAX_TG = 8192                          # upper bound on rows per batch tile
_SMALL_BYPASS_BYTES = 256 * 1024        # below this total input traffic, plain XLA is faster


def _reference_loss(output1, output2, label, margin=MARGIN):
    # Pure-JAX reference mirroring the PyTorch module (f32 math).
    o1 = output1.astype(jnp.float32)
    o2 = output2.astype(jnp.float32)
    diff = o1 - o2 + PD_EPS
    d = jnp.sqrt(jnp.sum(diff * diff, axis=-1))
    lab = jnp.asarray(label, jnp.float32).reshape(d.shape)
    return jnp.mean((1.0 - lab) * d ** 2 + lab * jnp.maximum(margin - d, 0.0) ** 2)


def _contrastive_kernel(o1_ref, o2_ref, lab_ref, out_ref, *, margin, eps, d, r):
    """One batch tile.

    o1_ref/o2_ref: (TG, L) native-dtype VMEM blocks, L = r * d lanes.
    lab_ref:       (TG, r) f32 labels (one per packed embedding row).
    out_ref:       (TG, r) f32 per-row loss terms (mean taken in the wrapper).
    """
    o1 = o1_ref[...].astype(jnp.float32)          # upcast in-kernel (native dtype over HBM)
    o2 = o2_ref[...].astype(jnp.float32)
    diff = o1 - o2 + eps                          # PyTorch adds eps to the difference
    sq = diff * diff

    if r == 1:
        sumsq = jnp.sum(sq, axis=-1, keepdims=True)                       # (TG, 1)
    else:
        # r embedding rows packed per 128-lane sublane-row; exact f32 segmented sums
        # over static lane slices (d divides 128, so slices sit on nice boundaries).
        parts = [
            jnp.sum(sq[:, j * d:(j + 1) * d], axis=-1, keepdims=True)
            for j in range(r)
        ]
        sumsq = jnp.concatenate(parts, axis=-1)                           # (TG, r)

    dist = jnp.sqrt(sumsq)                        # euclidean distance per row (EUP)
    lab = lab_ref[...]                            # (TG, r)
    hinge = jnp.maximum(margin - dist, 0.0)
    # Use sumsq directly for the non-matching-pair term (== d**2, but exact).
    out_ref[...] = (1.0 - lab) * sumsq + lab * (hinge * hinge)


def contrastive_loss(output1, output2, label, margin=MARGIN, use_pallas=None):
    """output1, output2: (B, D) any float dtype; label: (B,) or (B,1). Returns scalar f32."""
    B, D = output1.shape
    dt = jnp.promote_types(output1.dtype, output2.dtype)
    o1 = output1.astype(dt)                       # no-op when dtypes already match
    o2 = output2.astype(dt)
    lab = jnp.asarray(label, jnp.float32).reshape(-1)
    itemsize = jnp.dtype(dt).itemsize

    # ---- tiny-problem bypass (launch overhead would dominate) ----------------
    if use_pallas is None:
        use_pallas = (2 * B * D * itemsize) >= _SMALL_BYPASS_BYTES
    if not use_pallas:
        return _reference_loss(o1, o2, lab, margin)

    # ---- zero-copy lane packing ----------------------------------------------
    # Pack r = 128//D rows per 128-lane sublane-row only when it costs no pad:
    # D divides 128 (8 <= D < 128) and B is a multiple of r. Otherwise r = 1 and
    # the block last dim is the full D (allowed; Mosaic masks the partial lanes).
    if 8 <= D < 128 and 128 % D == 0 and B % (128 // D) == 0:
        r = 128 // D
    else:
        r = 1
    G = B // r                                    # packed group-rows
    L = D * r

    o1p = o1.reshape(G, L)                        # free row-major repack (or no-op when r == 1)
    o2p = o2.reshape(G, L)
    labp = lab.reshape(G, r)

    # ---- batch tile size from the VMEM budget ---------------------------------
    # Native sublane packing: 8 rows f32, 16 rows bf16/f16, 32 rows int8/fp8.
    row_align = max(8, (8 * 4) // itemsize)
    # 2 inputs x 2 pipeline buffers x L x itemsize + double-buffered label/out (f32, r wide).
    bytes_per_row = 4 * L * itemsize + 16 * r
    tg_cap = max(row_align,
                 ((_VMEM_BUDGET_BYTES // bytes_per_row) // row_align) * row_align)
    # Prefer >= 2 grid steps so the "parallel" axis can feed both TCs on v7x.
    two_tile = max(row_align, pl.cdiv(pl.cdiv(G, 2), row_align) * row_align)
    TG = min(tg_cap, two_tile, _MAX_TG)
    if TG >= G:
        TG = G                                    # single full-extent tile (block dims == array dims)
    n_tiles = pl.cdiv(G, TG)                      # last block may be ragged; Pallas masks it

    kernel = functools.partial(
        _contrastive_kernel, margin=float(margin), eps=PD_EPS, d=D, r=r)

    cost = pl.CostEstimate(
        flops=6 * B * D,                          # sub/add-eps/square + sums + hinge math
        transcendentals=B,                        # one sqrt per row
        bytes_accessed=2 * B * D * itemsize + 8 * B)

    per_row = pl.pallas_call(
        kernel,
        out_shape=jax.ShapeDtypeStruct((G, r), jnp.float32),
        grid=(n_tiles,),
        in_specs=[
            pl.BlockSpec((TG, L), lambda i: (i, 0)),
            pl.BlockSpec((TG, L), lambda i: (i, 0)),
            pl.BlockSpec((TG, r), lambda i: (i, 0)),
        ],
        out_specs=pl.BlockSpec((TG, r), lambda i: (i, 0)),
        compiler_params=pltpu.CompilerParams(
            dimension_semantics=("parallel",),    # no cross-iteration state -> megacore-shardable
            vmem_limit_bytes=_VMEM_LIMIT_BYTES),
        cost_estimate=cost,
    )(o1p, o2p, labp)

    # Mean over the true batch rows (exactly B values; slice kept for safety).
    return jnp.mean(per_row.reshape(-1)[:B])


if __name__ == "__main__":
    key = jax.random.PRNGKey(0)
    k1, k2, k3 = jax.random.split(key, 3)

    def _check(o1, o2, lab, **kw):
        loss = jax.block_until_ready(contrastive_loss(o1, o2, lab, **kw))
        ref = _reference_loss(o1, o2, lab)
        assert jnp.allclose(loss, ref, rtol=1e-5, atol=1e-5), (loss, ref)

    # 1) Tiny shape consistent with the module's forward -> auto small-problem bypass.
    B, D = 8, 32
    o1 = jax.random.normal(k1, (B, D), dtype=jnp.float32)
    o2 = jax.random.normal(k2, (B, D), dtype=jnp.float32)
    lab = jax.random.bernoulli(k3, 0.5, (B,)).astype(jnp.float32)
    _check(o1, o2, lab)

    # 2) Pallas path, f32, zero-copy lane packing (r=4), 2-step parallel grid.
    B, D = 64, 32
    o1 = jax.random.normal(k1, (B, D), dtype=jnp.float32)
    o2 = jax.random.normal(k2, (B, D), dtype=jnp.float32)
    lab = jax.random.bernoulli(k3, 0.5, (B,)).astype(jnp.float32)
    _check(o1, o2, lab, use_pallas=True)

    # 3) Pallas path, native bf16 over HBM (kernel upcasts in VMEM), packed.
    _check(o1.astype(jnp.bfloat16), o2.astype(jnp.bfloat16), lab, use_pallas=True)

    # 4) Awkward shape: D not a multiple of 128, B not tile-aligned -> no feature pad,
    #    full-D block last dim, ragged (masked) final block.
    B2, D2 = 13, 160
    a = jax.random.normal(k1, (B2, D2), dtype=jnp.float32)
    b = jax.random.normal(k2, (B2, D2), dtype=jnp.float32)
    lab2 = jax.random.bernoulli(k3, 0.5, (B2,)).astype(jnp.float32)
    _check(a, b, lab2, use_pallas=True)

    # 5) Small non-pow2 D (no packing possible), bf16, ragged final block.
    B3, D3 = 48, 48
    a = jax.random.normal(k1, (B3, D3), dtype=jnp.bfloat16)
    b = jax.random.normal(k2, (B3, D3), dtype=jnp.bfloat16)
    lab3 = jax.random.bernoulli(k3, 0.5, (B3,)).astype(jnp.float32)
    _check(a, b, lab3, use_pallas=True)

    print("KERNEL_OK")
</pallas_src>

<mosaic_0001>
module attributes {stable_mosaic.version = 11 : i64} {
  func.func @_contrastive_kernel(%arg0: i32, %arg1: memref<8x128xf32, #tpu.memory_space<vmem>>, %arg2: memref<8x128xf32, #tpu.memory_space<vmem>>, %arg3: memref<8x4xf32, #tpu.memory_space<vmem>>, %arg4: memref<8x4xf32, #tpu.memory_space<vmem>>) attributes {dimension_semantics = [#tpu.dimension_semantics<parallel>], iteration_bounds = array<i64: 2>, scalar_prefetch = 0 : i64, scratch_operands = 0 : i64, tpu.core_type = #tpu.core_type<tc>, window_params = [{transform_indices = @transform_0, window_bounds = array<i64: 8, 128>}, {transform_indices = @transform_1, window_bounds = array<i64: 8, 128>}, {transform_indices = @transform_2, window_bounds = array<i64: 8, 4>}, {transform_indices = @transform_3, window_bounds = array<i64: 8, 4>}]} {
    %c0 = arith.constant 0 : index
    %c0_0 = arith.constant 0 : index
    %0 = vector.load %arg1[%c0, %c0_0] : memref<8x128xf32, #tpu.memory_space<vmem>>, vector<8x128xf32>
    %c0_1 = arith.constant 0 : index
    %c0_2 = arith.constant 0 : index
    %1 = vector.load %arg2[%c0_1, %c0_2] : memref<8x128xf32, #tpu.memory_space<vmem>>, vector<8x128xf32>
    %2 = arith.subf %0, %1 : vector<8x128xf32>
    %cst = arith.constant 9.99999997E-7 : f32
    %3 = vector.broadcast %cst : f32 to vector<8x128xf32>
    %4 = arith.addf %2, %3 : vector<8x128xf32>
    %5 = arith.mulf %4, %4 : vector<8x128xf32>
    %6 = vector.extract_strided_slice %5 {offsets = [0, 0], sizes = [8, 32], strides = [1, 1]} : vector<8x128xf32> to vector<8x32xf32>
    %cst_3 = arith.constant dense<0.000000e+00> : vector<8xf32>
    %7 = vector.multi_reduction <add>, %6, %cst_3 [1] : vector<8x32xf32> to vector<8xf32>
    %8 = vector.shape_cast %7 : vector<8xf32> to vector<8x1xf32>
    %9 = vector.extract_strided_slice %5 {offsets = [0, 32], sizes = [8, 32], strides = [1, 1]} : vector<8x128xf32> to vector<8x32xf32>
    %cst_4 = arith.constant dense<0.000000e+00> : vector<8xf32>
    %10 = vector.multi_reduction <add>, %9, %cst_4 [1] : vector<8x32xf32> to vector<8xf32>
    %11 = vector.shape_cast %10 : vector<8xf32> to vector<8x1xf32>
    %12 = vector.extract_strided_slice %5 {offsets = [0, 64], sizes = [8, 32], strides = [1, 1]} : vector<8x128xf32> to vector<8x32xf32>
    %cst_5 = arith.constant dense<0.000000e+00> : vector<8xf32>
    %13 = vector.multi_reduction <add>, %12, %cst_5 [1] : vector<8x32xf32> to vector<8xf32>
    %14 = vector.shape_cast %13 : vector<8xf32> to vector<8x1xf32>
    %15 = vector.extract_strided_slice %5 {offsets = [0, 96], sizes = [8, 32], strides = [1, 1]} : vector<8x128xf32> to vector<8x32xf32>
    %cst_6 = arith.constant dense<0.000000e+00> : vector<8xf32>
    %16 = vector.multi_reduction <add>, %15, %cst_6 [1] : vector<8x32xf32> to vector<8xf32>
    %17 = vector.shape_cast %16 : vector<8xf32> to vector<8x1xf32>
    %18 = tpu.concatenate %8, %11, %14, %17 in 1 : vector<8x1xf32>, vector<8x1xf32>, vector<8x1xf32>, vector<8x1xf32> -> vector<8x4xf32>
    %19 = math.sqrt %18 : vector<8x4xf32>
    %c0_7 = arith.constant 0 : index
    %c0_8 = arith.constant 0 : index
    %20 = vector.load %arg3[%c0_7, %c0_8] : memref<8x4xf32, #tpu.memory_space<vmem>>, vector<8x4xf32>
    %cst_9 = arith.constant 9.900000e-01 : f32
    %21 = vector.broadcast %cst_9 : f32 to vector<8x4xf32>
    %22 = arith.subf %21, %19 : vector<8x4xf32>
    %cst_10 = arith.constant 0.000000e+00 : f32
    %23 = vector.broadcast %cst_10 : f32 to vector<8x4xf32>
    %24 = arith.maximumf %22, %23 : vector<8x4xf32>
    %cst_11 = arith.constant 1.000000e+00 : f32
    %25 = vector.broadcast %cst_11 : f32 to vector<8x4xf32>
    %26 = arith.subf %25, %20 : vector<8x4xf32>
    %27 = arith.mulf %26, %18 : vector<8x4xf32>
    %28 = arith.mulf %24, %24 : vector<8x4xf32>
    %29 = arith.mulf %20, %28 : vector<8x4xf32>
    %30 = arith.addf %27, %29 : vector<8x4xf32>
    %c0_12 = arith.constant 0 : index
    %c0_13 = arith.constant 0 : index
    %31 = vector.load %arg4[%c0_12, %c0_13] : memref<8x4xf32, #tpu.memory_space<vmem>>, vector<8x4xf32>
    tpu.vector_store %arg4[%c0_12, %c0_13], %30 {strides = array<i32>} : memref<8x4xf32, #tpu.memory_space<vmem>>, vector<8x4xf32>,
    return
  }
  func.func @transform_0(%arg0: i32) -> (i32, i32) {
    %c0_i32 = arith.constant 0 : i32
    %c0_i32_0 = arith.constant 0 : i32
    return %arg0, %c0_i32 : i32, i32
  }
  func.func @transform_1(%arg0: i32) -> (i32, i32) {
    %c0_i32 = arith.constant 0 : i32
    %c0_i32_0 = arith.constant 0 : i32
    return %arg0, %c0_i32 : i32, i32
  }
  func.func @transform_2(%arg0: i32) -> (i32, i32) {
    %c0_i32 = arith.constant 0 : i32
    %c0_i32_0 = arith.constant 0 : i32
    return %arg0, %c0_i32 : i32, i32
  }
  func.func @transform_3(%arg0: i32) -> (i32, i32) {
    %c0_i32 = arith.constant 0 : i32
    %c0_i32_0 = arith.constant 0 : i32
    return %arg0, %c0_i32 : i32, i32
  }
}

</mosaic_0001>

<bundles_post_ra>
// kernel: tpu_custom_call.1
= control target key start
LH: loop header
LB: loop body
LE: loop exit
PB: predicated region body
PF: predicated region fallthrough
CT: control target
= control target key end

     0   :  { %8 = vsyncpa [#allocation3], 0  ;;  %s624_s0 = inlined_call_operand.vmem [shape: f32[16,128], index: 0, kind: input, shape index: {}]   ;;  %s625_s1 = inlined_call_operand.hbm [shape: f32[16,128], index: 1, kind: input, shape index: {}]   ;;  %s626_s2 = inlined_call_operand.vmem [shape: f32[16,4], index: 2, kind: input, shape index: {}]   ;;  %s627_s3 = inlined_call_operand.vmem [shape: f32[16,4], index: 3, kind: output, shape index: {}]  }
   0x1   :  { %10 = vsyncpa [#allocation3 + $0x1], 0  ;;  %s506_s12 = smov 0   ;;  %s508_s13 = smov 0  }
   0x2   :  { %s510_s14 = smov 0   ;;  %s512_s15 = smov 0  }
   0x3 LB: > { %s525_s16 = sadd.s32 4294967295, %s480_s15   ;;  %s528_s17 = sadd.s32 1, %s480_s15   ;;  %s480_s15 = sphi %s512_s15, %s635_s15   ;;  %s476_s14 = sphi %s510_s14, %s634_s14   ;;  %s472_s13 = sphi %s508_s13, %s633_s13   ;;  %s468_s12 = sphi %s506_s12, %s632_s12  }
   0x4   : > { %s46_s18 = ssub.s32 %s480_s15, %s528_s17  ;;  %s49_s19 = sadd.s32 1, %s476_s14 }
   0x5   : > { %p47_p0 = scmp.eq.s32.totalorder %s46_s18, 0  ;;  %p56_p1 = scmp.ne.s32.totalorder %s476_s14, %s472_s13 }
   0x6   : > { %p57_p2 = scmp.eq.s32.totalorder %s480_s15, 0  ;;  %p62_p3 = scmp.ne.s32.totalorder %s472_s13, %s468_s12 }
   0x7   : > { %s538_s20 = scalar_select %p47_p0, %s476_s14, %s49_s19  }
   0x8   : > { %p58_p4 = por %p57_p2, %p56_p1  ;;  %p63_p5 = scmp.eq.s32.totalorder %s525_s16, 0 }
   0x9   : > { %p378_p6 = scmp.lt.s32.totalorder %s480_s15, 2  ;;  %s145_s22 = sand.u32 1, %s476_s14  }
   0xa   : > { %p542_p7 = por %p63_p5, %p62_p3  ;;  %s363_s23 = sshll.u32 %s145_s22, 3 }
   0xb   : > { %s364_s24 = sshll.u32 %s480_s15, 7  ;;  %s149_s28 = scalar_lea.vmem [#allocation2], %s363_s23 }
   0xc   : > { %s551_s27 = scalar_lea.hbm %s625_s1, %s364_s24  ;;  %s156_s29 = sshll.u32 %s149_s28, 4  ;;  %s553_s29 = int_to_ptr.vmem [resolvable:$true] %s156_s29 }
   0xd   : > { %p555_p8 = pnand %p378_p6, %p58_p4  ;;  %s146_s4 = scalar_lea.sflag [#allocation3], %s145_s22 }
   0xe   : > { %s416_s5 = scalar_lea.hbm %s551_s27, 128  ;;  %s421_s8 = scalar_lea.hbm %s625_s1, 256 }
   0xf   : > { %p417_p11 = scmp.ne.s32.totalorder %s551_s27, %s416_s5  ;;  %p418_p12 = pneg %p555_p8 }
  0x10   : > { %p422_p1 = scmp.lt.u32.totalorder %s551_s27, %s625_s1  ;;  %p423_p2 = scmp.lt.u32.totalorder %s421_s8, %s416_s5 }
  0x11   : > { %p419_p13 = pnand %p418_p12, %p417_p11  ;;  %p425_p4 = scmp.lt.u32.totalorder %s416_s5, %s551_s27 }
  0x12   : > { %p424_p3 = por %p423_p2, %p422_p1 }
  0x13   : > { %p420_p0 = pneg %p419_p13 }
  0x14   : > { %p426_p5 = por %p425_p4, %p424_p3 }
  0x16   : > { %p427_p6 = pnand %p426_p5, %p420_p0 }
  0x18   : > { %430 = shalt.err (!%p427_p6)
}
  0x19   : > { %s431_s11 = scalar_lea.vmem %s553_s29, 128  ;;  %s482_s12 = smov [#allocation2]  }
  0x1a   : > { %p432_p11 = scmp.ne.s32.totalorder %s553_s29, %s431_s11  ;;  %s436_s18 = sshll.u32 %s482_s12, 4  ;;  %s437_s18 = int_to_ptr.vmem [resolvable:$false] %s436_s18 }
  0x1b   : > { %s438_s19 = scalar_lea.vmem %s437_s18, 256  ;;  %p439_p10 = scmp.lt.s32.totalorder %s553_s29, %s437_s18 }
  0x1c   : > { %p434_p13 = pnand %p432_p11, %p418_p12  ;;  %p440_p1 = scmp.lt.s32.totalorder %s438_s19, %s431_s11 }
  0x1e   : > { %p435_p9 = pneg %p434_p13  ;;  %p441_p2 = por %p440_p1, %p439_p10 }
  0x20   : > { %p442_p3 = pnand %p441_p2, %p435_p9 }
  0x22   : > { %445 = shalt.err (!%p442_p3)
}
  0x23   : > { %377 = dma.hbm_to_vmem [thread:$0]  (!%p555_p8), %s551_s27, 128, %s553_s29, %s146_s4  }
  0x24   : > { %p630_p0 = scmp.lt.s32.totalorder %s480_s15, 3  ;;  %p631_p4 = scmp.ge.s32.totalorder %s480_s15, 1 }
  0x26   : > { %p169_p12 = pnand %p631_p4, %p630_p0 }
  0x27   : > { %s174_s22 = sand.u32 (!%p169_p12), 1, %s472_s13  }
  0x28   : > { %172 = sbr.rel (%p169_p12) target bundleno = 350 (0x15e), region = 32  ;;  %s366_s23 = sshll.u32 (!%p169_p12), %s174_s22, 3 }
  0x29   : > { %s175_s24 = scalar_lea.sflag (!%p169_p12), [#allocation3], %s174_s22  ;;  %s178_s25 = scalar_lea.vmem (!%p169_p12), [#allocation2], %s366_s23 }
  0x2f   : > { %463 = dma.done.wait (%p542_p7), %s175_s24, 128  }
  0x30   : > { %465 = vsyncadd (%p542_p7), %s175_s24, 4294967168  ;;  %p208_p9 = scmp.lt.s32.totalorder %s525_s16, 1  ;;  %v221_v1 = vld [vmem:[%s178_s25] sm:$0xff]  ;;  %s483_s29 = smov 96   ;;  %vm225_vm0 = vcmask 261120   ;;  %vm248_vm1 = vcmask 7168  }
  0x31   : > { %s484_s21 = smov 32   ;;  %s485_s30 = smov 64   ;;  %vm250_vm2 = vcmask 15360   ;;  %vm252_vm3 = vcmask 23552   ;;  %vm269_vm6 = vcmask 31744  }
  0x32   : > { %s637_s16 = smov (!%p208_p9, %s525_s16), 1 }
  0x33   : > { %s597_s26 = sshll.u32 %s637_s16, 3 }
  0x34   : > { %s211_s28 = scalar_lea.vmem %s624_s0, %s597_s26  ;;  %s215_s5 = scalar_lea.vmem %s626_s2, %s597_s26 }
  0x35   : > { %v220_v0 = vld [vmem:[%s211_s28] sm:$0xff]  ;;  %s219_s8 = scalar_lea.vmem %s627_s3, %s597_s26 }
  0x36   : > { %v222_v2 = vsub.f32 %v220_v0, %v221_v1  ;;  %v261_v23 = vld [vmem:[%s215_s5] sm:$0xff] }
  0x37   : > { %v264_v26 = vsub.f32 1.0, %v261_v23 }
  0x38   : > { %v223_v3 = vadd.f32 1e-06, %v222_v2 }
  0x3a   : > { %v224_v4 = vmul.f32 %v223_v3, %v223_v3 }
  0x3c   : > { %230 = vrot.lane.b32.xlu0 %v224_v4, %s483_s29  ;;  %242 = vrot.lane.b32.xlu1 %v224_v4, %s484_s21  ;;  %v226_v5 = vsel %vm225_vm0, %v224_v4, 0.0 }
  0x40   : > { %236 = vrot.lane.b32.xlu0 %v224_v4, %s485_s30 }
  0x60   : > { %227 = vadd.xlane.f32.xlu1 %v226_v5 }
  0xae   : > { %v231_v6 = vpop.permute.xlu0 %230  ;;  %v243_v7 = vpop.permute.xlu1 %242 }
  0xaf   : > { %v233_v8 = vsel %vm225_vm0, %v231_v6, 0.0  ;;  %v245_v9 = vsel %vm225_vm0, %v243_v7, 0.0 }
  0xb0   : > { %234 = vadd.xlane.f32.xlu0 %v233_v8  ;;  %246 = vadd.xlane.f32.xlu1 %v245_v9 }
  0xb2   : > { %v237_v10 = vpop.permute.xlu0 %236 }
  0xb3   : > { %v239_v11 = vsel %vm225_vm0, %v237_v10, 0.0 }
  0xb4   : > { %240 = vadd.xlane.f32.xlu0 %v239_v11 }
  0xed   : > { %v228_v12 = vpop.xlane.xlu1 %227 }
 0x13d   : > { %v235_v13 = vpop.xlane.xlu0 %234  ;;  %v247_v14 = vpop.xlane.xlu1 %246 }
 0x13e   : > { %v249_v15 = vsel %vm248_vm1, %v228_v12, %v235_v13 }
 0x141   : > { %v241_v16 = vpop.xlane.xlu0 %240 }
 0x142   : > { %v251_v17 = vsel %vm250_vm2, %v249_v15, %v241_v16 }
 0x143   : > { %v253_v18 = vsel %vm252_vm3, %v251_v17, %v247_v14 }
 0x144   : > { %414 = vrsqrt.f32 %v253_v18  ;;  %vm256_vm4 = vcmp.eq.f32.partialorder %v253_v18, inf  ;;  %v259_v21 = vand.u32 2147483648, %v253_v18  ;;  %vm258_vm5 = vcmp.eq.f32.partialorder %v253_v18, 0.0 }
 0x145   : > { %v265_v29 = vmul.f32 %v264_v26, %v253_v18 }
 0x14e   : > { %v415_v19 = vpop.eup %414 }
 0x14f   : > { %v255_v20 = vmul.f32 %v415_v19, %v253_v18 }
 0x151   : > { %v257_v22 = vsel %vm256_vm4, %v253_v18, %v255_v20 }
 0x152   : > { %v260_v24 = vsel %vm258_vm5, %v259_v21, %v257_v22 }
 0x153   : > { %v262_v25 = vsub.f32 0.99, %v260_v24 }
 0x155   : > { %v263_v27 = vmax.f32 %v262_v25, 0.0 }
 0x157   : > { %v266_v28 = vmul.f32 %v263_v27, %v263_v27 }
 0x159   : > { %v267_v30 = vmul.f32 %v266_v28, %v261_v23 }
 0x15b   : > { %v268_v31 = vadd.f32 %v267_v30, %v265_v29 }
 0x15d   : > { %270 = vst.msk [vmem:[%s219_s8] sm:$0xff] %vm269_vm6, %v268_v31 }
 0x15e PF: > { %p13_p7 = scmp.ge.s32.totalorder %s528_s17, 4   ;;  %s632_s12 = smov %s472_s13 }
 0x15f   : > { %s633_s13 = smov %s476_s14  ;;  %s634_s14 = smov %s538_s20 }
 0x160   : > { %s635_s15 = smov %s528_s17  ;;  %15 = sbr.rel (!%p13_p7) target bundleno = 3 (0x3), region = 78 }
 0x167   :  { %290 = vsyncpa [#allocation3], 1 }
 0x168   :  { %292 = vsyncpa [#allocation3 + $0x1], 1 }

</bundles_post_ra>
